<compile_context>
chip_gen: v6e
topology: v6e:2x2x1
jax: 0.10.0
libtpu: 0.0.40
codegen_flags: <defaults>
</compile_context>

<pallas_src>
import math
from functools import partial

import jax
import jax.numpy as jnp
from jax.experimental import pallas as pl
from jax.experimental.pallas import tpu as pltpu

LANE = 128            # hidden dims are lane-padded to 128 (weights slab only)
SUBLANE = 8
MAX_TILE_B = 1024     # large tiles amortize the ~0.35 us per-grid-step overhead
SINGLE_TILE_MAX = 512  # below this batch, one tile (splitting is pure overhead)


def _round_up(x, m):
    return (x + m - 1) // m * m


def _choose_tiling(batch):
    """Pick (tile_b, num_tiles). For large batches use an even tile count so the
    'parallel' grid axis splits evenly across both TensorCores on v7x."""
    b8 = _round_up(max(batch, 1), SUBLANE)
    if b8 <= SINGLE_TILE_MAX:
        return b8, 1
    n = max(2, math.ceil(b8 / MAX_TILE_B))
    if n % 2:
        n += 1
    tile_b = _round_up(math.ceil(b8 / n), SUBLANE)
    return tile_b, n


def dqn_kernel(x_ref, w_ref, b_ref, out_ref):
    # Fused 4-layer MLP on one (tile_b, k1) batch tile.
    # x/W in bf16 for native MXU passes; accumulate + bias + ReLU in f32.
    k1 = x_ref.shape[-1]        # round_up(state_size, 8), static
    n_out = out_ref.shape[-1]   # round_up(action_size, 8), static

    # Layer 1: contract only over the true (sublane-padded) feature count.
    h = jnp.dot(x_ref[...], w_ref[0][:k1, :],
                preferred_element_type=jnp.float32) + b_ref[0]
    h = jnp.maximum(h, 0.0)
    h = jnp.dot(h.astype(jnp.bfloat16), w_ref[1],
                preferred_element_type=jnp.float32) + b_ref[1]
    h = jnp.maximum(h, 0.0)
    h = jnp.dot(h.astype(jnp.bfloat16), w_ref[2],
                preferred_element_type=jnp.float32) + b_ref[2]
    h = jnp.maximum(h, 0.0)
    y = jnp.dot(h.astype(jnp.bfloat16), w_ref[3],
                preferred_element_type=jnp.float32) + b_ref[3]
    # Padded output lanes (>= action_size) are exactly zero (zero W cols / b lanes).
    out_ref[...] = y[:, :n_out]


def pack_params(params):
    """Pack the 4 (in,out) weights into one bf16 (4,128,128) slab and the 4
    (1,out) biases into one f32 (4,1,128) slab (2 parameter DMAs total).
    Call ONCE per parameter update -- hoisted out of the per-forward path."""
    w_all = jnp.zeros((4, LANE, LANE), jnp.bfloat16)
    b_all = jnp.zeros((4, 1, LANE), jnp.float32)
    for i in range(4):
        w = params[f"w{i + 1}"]
        b = params[f"b{i + 1}"]
        fin, fout = w.shape
        w_all = w_all.at[i, :fin, :fout].set(w.astype(jnp.bfloat16))
        b_all = b_all.at[i, :, :fout].set(b.astype(jnp.float32))
    return w_all, b_all


@partial(jax.jit, static_argnames=("action_size",))
def dqn_forward(x, w_all, b_all, *, action_size):
    """x: (batch, state_size); w_all: (4,128,128) bf16; b_all: (4,1,128) f32."""
    batch, state_size = x.shape
    k1p = _round_up(state_size, SUBLANE)
    n_out = _round_up(action_size, SUBLANE)

    tile_b, num_tiles = _choose_tiling(batch)
    batch_p = tile_b * num_tiles

    # Narrow bf16 input stream: feature dim rounded to a sublane (8), not 128
    # lanes. Padded rows/cols are zero and stay zero through every layer.
    x_p = jnp.zeros((batch_p, k1p), jnp.bfloat16)
    x_p = x_p.at[:batch, :state_size].set(x.astype(jnp.bfloat16))

    # FLOPs actually executed (padded matmuls) and the new, smaller byte counts.
    flops = 2 * batch_p * (k1p * LANE + 3 * LANE * LANE)
    bytes_accessed = (x_p.size * 2 + batch_p * n_out * 4
                      + w_all.size * 2 + b_all.size * 4)
    cost = pl.CostEstimate(flops=flops, transcendentals=0,
                           bytes_accessed=bytes_accessed)

    out_p = pl.pallas_call(
        dqn_kernel,
        out_shape=jax.ShapeDtypeStruct((batch_p, n_out), jnp.float32),
        grid=(num_tiles,),
        in_specs=[
            # x tile streams with the grid (double-buffered pipeline).
            pl.BlockSpec((tile_b, k1p), lambda i: (i, 0)),
            # weights & biases: constant index_map -> VMEM-resident, 1 DMA each.
            pl.BlockSpec((4, LANE, LANE), lambda i: (0, 0, 0)),
            pl.BlockSpec((4, 1, LANE), lambda i: (0, 0, 0)),
        ],
        out_specs=pl.BlockSpec((tile_b, n_out), lambda i: (i, 0)),
        compiler_params=pltpu.CompilerParams(
            dimension_semantics=("parallel",),   # shard batch tiles across TCs (v7x)
            vmem_limit_bytes=32 * 1024 * 1024),
        cost_estimate=cost,
    )(x_p, w_all, b_all)

    # Only the batch padding remains to slice; last dim is already narrow.
    return out_p[:batch, :action_size]


def init_dqn_params(key, state_size, action_size):
    """Deterministic init mimicking PyTorch nn.Linear default:
    U(-1/sqrt(fan_in), 1/sqrt(fan_in)) for both weight and bias."""
    dims = [(state_size, 32), (32, 64), (64, 16), (16, action_size)]
    params = {}
    for i, (fin, fout) in enumerate(dims, start=1):
        key, kw, kb = jax.random.split(key, 3)
        bound = 1.0 / jnp.sqrt(jnp.float32(fin))
        # stored as (in, out) so kernel does x @ W
        params[f"w{i}"] = jax.random.uniform(
            kw, (fin, fout), jnp.float32, -bound, bound)
        params[f"b{i}"] = jax.random.uniform(
            kb, (1, fout), jnp.float32, -bound, bound)
    return params


def dqn_reference(x, params, compute_dtype=jnp.float32):
    """Pure-JAX reference. compute_dtype=bf16 mimics the kernel's bf16 streaming
    (f32 accumulation); compute_dtype=f32 is the exact torch-like forward."""
    h = x.astype(jnp.float32)
    for i in range(1, 5):
        w = params[f"w{i}"].astype(compute_dtype)
        z = jnp.dot(h.astype(compute_dtype), w,
                    preferred_element_type=jnp.float32) + params[f"b{i}"]
        h = z if i == 4 else jnp.maximum(z, 0.0)
    return h


if __name__ == "__main__":
    key = jax.random.PRNGKey(0)
    state_size, action_size, batch = 8, 4, 2

    kp, kx = jax.random.split(key)
    params = init_dqn_params(kp, state_size, action_size)
    # Pack once (hoisted out of the per-forward path).
    w_all, b_all = pack_params(params)

    x = jax.random.normal(kx, (batch, state_size), jnp.float32)
    out = dqn_forward(x, w_all, b_all, action_size=action_size)
    jax.block_until_ready(out)

    assert out.shape == (batch, action_size)
    # Tight check vs. a bf16-streaming reference (same arithmetic as the kernel).
    ref_bf16 = dqn_reference(x, params, jnp.bfloat16)
    assert jnp.allclose(out, ref_bf16, atol=5e-3, rtol=5e-3)
    # Loose check vs. the exact f32 torch-like forward (bf16 input/weight rounding).
    ref_f32 = dqn_reference(x, params, jnp.float32)
    assert jnp.allclose(out, ref_f32, atol=1e-1, rtol=1e-1)

    # Also exercise the multi-tile / dual-TensorCore path with a larger batch.
    xb = jax.random.normal(kx, (1500, state_size), jnp.float32)
    outb = dqn_forward(xb, w_all, b_all, action_size=action_size)
    jax.block_until_ready(outb)
    assert jnp.allclose(outb, dqn_reference(xb, params, jnp.bfloat16),
                        atol=5e-3, rtol=5e-3)
    assert jnp.allclose(outb, dqn_reference(xb, params, jnp.float32),
                        atol=1e-1, rtol=1e-1)

    print("KERNEL_OK")
</pallas_src>

<mosaic_0001>
module attributes {stable_mosaic.version = 11 : i64} {
  func.func @dqn_kernel(%arg0: i32, %arg1: memref<8x8xbf16, #tpu.memory_space<vmem>>, %arg2: memref<4x128x128xbf16, #tpu.memory_space<vmem>>, %arg3: memref<4x1x128xf32, #tpu.memory_space<vmem>>, %arg4: memref<8x8xf32, #tpu.memory_space<vmem>>) attributes {dimension_semantics = [#tpu.dimension_semantics<parallel>], iteration_bounds = array<i64: 1>, scalar_prefetch = 0 : i64, scratch_operands = 0 : i64, tpu.core_type = #tpu.core_type<tc>, window_params = [{transform_indices = @transform_0, window_bounds = array<i64: 8, 8>}, {pipeline_mode = #tpu.pipeline_mode<synchronous>, transform_indices = @transform_1, window_bounds = array<i64: 4, 128, 128>}, {pipeline_mode = #tpu.pipeline_mode<synchronous>, transform_indices = @transform_2, window_bounds = array<i64: 4, 1, 128>}, {transform_indices = @transform_3, window_bounds = array<i64: 8, 8>}]} {
    %c0 = arith.constant 0 : index
    %c0_0 = arith.constant 0 : index
    %0 = vector.load %arg1[%c0, %c0_0] : memref<8x8xbf16, #tpu.memory_space<vmem>>, vector<8x8xbf16>
    %c0_1 = arith.constant 0 : index
    %c0_2 = arith.constant 0 : index
    %c0_3 = arith.constant 0 : index
    %1 = vector.load %arg2[%c0_1, %c0_2, %c0_3] : memref<4x128x128xbf16, #tpu.memory_space<vmem>>, vector<1x128x128xbf16>
    %2 = vector.shape_cast %1 : vector<1x128x128xbf16> to vector<128x128xbf16>
    %3 = vector.extract_strided_slice %2 {offsets = [0, 0], sizes = [8, 128], strides = [1, 1]} : vector<128x128xbf16> to vector<8x128xbf16>
    %cst = arith.constant dense<0.000000e+00> : vector<8x128xf32>
    %4 = tpu.matmul %0, %3, %cst {dimension_numbers = #tpu.dot_dimension_numbers<[1], [0], [0], [1], [0, 0, 1, 1], [], []>} : vector<8x8xbf16>, vector<8x128xbf16>, vector<8x128xf32> -> vector<8x128xf32>
    %c0_4 = arith.constant 0 : index
    %c0_5 = arith.constant 0 : index
    %c0_6 = arith.constant 0 : index
    %5 = vector.load %arg3[%c0_4, %c0_5, %c0_6] : memref<4x1x128xf32, #tpu.memory_space<vmem>>, vector<1x1x128xf32>
    %6 = vector.shape_cast %5 : vector<1x1x128xf32> to vector<1x128xf32>
    %7 = vector.broadcast %6 : vector<1x128xf32> to vector<8x128xf32>
    %8 = arith.addf %4, %7 : vector<8x128xf32>
    %cst_7 = arith.constant 0.000000e+00 : f32
    %9 = vector.broadcast %cst_7 : f32 to vector<8x128xf32>
    %10 = arith.maximumf %8, %9 : vector<8x128xf32>
    %11 = arith.truncf %10 : vector<8x128xf32> to vector<8x128xbf16>
    %c1 = arith.constant 1 : index
    %c0_8 = arith.constant 0 : index
    %c0_9 = arith.constant 0 : index
    %12 = vector.load %arg2[%c1, %c0_8, %c0_9] : memref<4x128x128xbf16, #tpu.memory_space<vmem>>, vector<1x128x128xbf16>
    %13 = vector.shape_cast %12 : vector<1x128x128xbf16> to vector<128x128xbf16>
    %cst_10 = arith.constant dense<0.000000e+00> : vector<8x128xf32>
    %14 = tpu.matmul %11, %13, %cst_10 {dimension_numbers = #tpu.dot_dimension_numbers<[1], [0], [0], [1], [0, 0, 1, 1], [], []>} : vector<8x128xbf16>, vector<128x128xbf16>, vector<8x128xf32> -> vector<8x128xf32>
    %c1_11 = arith.constant 1 : index
    %c0_12 = arith.constant 0 : index
    %c0_13 = arith.constant 0 : index
    %15 = vector.load %arg3[%c1_11, %c0_12, %c0_13] : memref<4x1x128xf32, #tpu.memory_space<vmem>>, vector<1x1x128xf32>
    %16 = vector.shape_cast %15 : vector<1x1x128xf32> to vector<1x128xf32>
    %17 = vector.broadcast %16 : vector<1x128xf32> to vector<8x128xf32>
    %18 = arith.addf %14, %17 : vector<8x128xf32>
    %cst_14 = arith.constant 0.000000e+00 : f32
    %19 = vector.broadcast %cst_14 : f32 to vector<8x128xf32>
    %20 = arith.maximumf %18, %19 : vector<8x128xf32>
    %21 = arith.truncf %20 : vector<8x128xf32> to vector<8x128xbf16>
    %c2 = arith.constant 2 : index
    %c0_15 = arith.constant 0 : index
    %c0_16 = arith.constant 0 : index
    %22 = vector.load %arg2[%c2, %c0_15, %c0_16] : memref<4x128x128xbf16, #tpu.memory_space<vmem>>, vector<1x128x128xbf16>
    %23 = vector.shape_cast %22 : vector<1x128x128xbf16> to vector<128x128xbf16>
    %cst_17 = arith.constant dense<0.000000e+00> : vector<8x128xf32>
    %24 = tpu.matmul %21, %23, %cst_17 {dimension_numbers = #tpu.dot_dimension_numbers<[1], [0], [0], [1], [0, 0, 1, 1], [], []>} : vector<8x128xbf16>, vector<128x128xbf16>, vector<8x128xf32> -> vector<8x128xf32>
    %c2_18 = arith.constant 2 : index
    %c0_19 = arith.constant 0 : index
    %c0_20 = arith.constant 0 : index
    %25 = vector.load %arg3[%c2_18, %c0_19, %c0_20] : memref<4x1x128xf32, #tpu.memory_space<vmem>>, vector<1x1x128xf32>
    %26 = vector.shape_cast %25 : vector<1x1x128xf32> to vector<1x128xf32>
    %27 = vector.broadcast %26 : vector<1x128xf32> to vector<8x128xf32>
    %28 = arith.addf %24, %27 : vector<8x128xf32>
    %cst_21 = arith.constant 0.000000e+00 : f32
    %29 = vector.broadcast %cst_21 : f32 to vector<8x128xf32>
    %30 = arith.maximumf %28, %29 : vector<8x128xf32>
    %31 = arith.truncf %30 : vector<8x128xf32> to vector<8x128xbf16>
    %c3 = arith.constant 3 : index
    %c0_22 = arith.constant 0 : index
    %c0_23 = arith.constant 0 : index
    %32 = vector.load %arg2[%c3, %c0_22, %c0_23] : memref<4x128x128xbf16, #tpu.memory_space<vmem>>, vector<1x128x128xbf16>
    %33 = vector.shape_cast %32 : vector<1x128x128xbf16> to vector<128x128xbf16>
    %cst_24 = arith.constant dense<0.000000e+00> : vector<8x128xf32>
    %34 = tpu.matmul %31, %33, %cst_24 {dimension_numbers = #tpu.dot_dimension_numbers<[1], [0], [0], [1], [0, 0, 1, 1], [], []>} : vector<8x128xbf16>, vector<128x128xbf16>, vector<8x128xf32> -> vector<8x128xf32>
    %c3_25 = arith.constant 3 : index
    %c0_26 = arith.constant 0 : index
    %c0_27 = arith.constant 0 : index
    %35 = vector.load %arg3[%c3_25, %c0_26, %c0_27] : memref<4x1x128xf32, #tpu.memory_space<vmem>>, vector<1x1x128xf32>
    %36 = vector.shape_cast %35 : vector<1x1x128xf32> to vector<1x128xf32>
    %37 = vector.broadcast %36 : vector<1x128xf32> to vector<8x128xf32>
    %38 = arith.addf %34, %37 : vector<8x128xf32>
    %39 = vector.extract_strided_slice %38 {offsets = [0, 0], sizes = [8, 8], strides = [1, 1]} : vector<8x128xf32> to vector<8x8xf32>
    %c0_28 = arith.constant 0 : index
    %c0_29 = arith.constant 0 : index
    %40 = vector.load %arg4[%c0_28, %c0_29] : memref<8x8xf32, #tpu.memory_space<vmem>>, vector<8x8xf32>
    tpu.vector_store %arg4[%c0_28, %c0_29], %39 {strides = array<i32>} : memref<8x8xf32, #tpu.memory_space<vmem>>, vector<8x8xf32>,
    return
  }
  func.func @transform_0(%arg0: i32) -> (i32, i32) {
    %c0_i32 = arith.constant 0 : i32
    %c0_i32_0 = arith.constant 0 : i32
    return %arg0, %c0_i32 : i32, i32
  }
  func.func @transform_1(%arg0: i32) -> (i32, i32, i32) {
    %c0_i32 = arith.constant 0 : i32
    %c0_i32_0 = arith.constant 0 : i32
    %c0_i32_1 = arith.constant 0 : i32
    %c0_i32_2 = arith.constant 0 : i32
    return %c0_i32, %c0_i32_0, %c0_i32_1 : i32, i32, i32
  }
  func.func @transform_2(%arg0: i32) -> (i32, i32, i32) {
    %c0_i32 = arith.constant 0 : i32
    %c0_i32_0 = arith.constant 0 : i32
    %c0_i32_1 = arith.constant 0 : i32
    %c0_i32_2 = arith.constant 0 : i32
    return %c0_i32, %c0_i32_0, %c0_i32_1 : i32, i32, i32
  }
  func.func @transform_3(%arg0: i32) -> (i32, i32) {
    %c0_i32 = arith.constant 0 : i32
    %c0_i32_0 = arith.constant 0 : i32
    return %arg0, %c0_i32 : i32, i32
  }
}

</mosaic_0001>

<bundles_post_ra>
// kernel: dqn_forward.1
= control target key start
LH: loop header
LB: loop body
LE: loop exit
PB: predicated region body
PF: predicated region fallthrough
CT: control target
= control target key end

     0   :  { %8 = vsyncpa [#allocation3], 0  ;;  %s615_s12 = smov [#allocation2]   ;;  %s696_s0 = inlined_call_operand.vmem [shape: bf16[8,8], index: 0, kind: input, shape index: {}]   ;;  %s697_s1 = inlined_call_operand.hbm [shape: bf16[4,128,128], index: 1, kind: input, shape index: {}]   ;;  %s698_s2 = inlined_call_operand.vmem [shape: f32[4,1,128], index: 2, kind: input, shape index: {}]   ;;  %s699_s3 = inlined_call_operand.vmem [shape: f32[8,8], index: 3, kind: output, shape index: {}]  }
   0x1   :  { %s16_s13 = sshll.u32 %s615_s12, 4  ;;  %s17_s13 = int_to_ptr.vmem [resolvable:$true] %s16_s13 }
   0x2   :  { %s601_s14 = scalar_lea.vmem %s17_s13, 4096  ;;  %p606_p1 = scmp.lt.s32.totalorder %s17_s13, %s17_s13 }
   0x3   :  { %p602_p0 = scmp.ne.s32.totalorder %s17_s13, %s601_s14  ;;  %p607_p2 = scmp.lt.s32.totalorder %s601_s14, %s601_s14 }
   0x5   :  { %p608_p3 = por %p607_p2, %p606_p1 }
   0x7   :  { %p609_p4 = pnand %p608_p3, %p602_p0 }
   0x9   :  { %612 = shalt.err (!%p609_p4)
}
   0xa   :  { %s616_s15 = smov 64   ;;  %s617_s16 = smov 4  }
   0xb   :  { %22 = dma.hbm_to_vmem [thread:$0]  %s697_s1, 4096, %s17_s13, [#allocation3], %s616_s15, %s616_s15, %s617_s16  }
   0xc   :  { %613 = dma.done.wait [#allocation3], 4096  }
   0xd   :  { %614 = vsyncadd [#allocation3], 4294963200  ;;  %v618_v0 = vmov 0.0   ;;  %vm619_vm0 = vmmov 0   ;;  %vm42_vm1 = vcmask 1043456   ;;  %vm38_vm2 = vcmask 64512  }
   0xe   :  { %498 = vmatprep.subr.bf16.mxu0 %v618_v0  ;;  %500 = vmatprep.mubr.msk.bf16.mxu0 %vm619_vm0, %v618_v0  ;;  %v30_v1 = vld [vmem:[#allocation2] sm:$0xf]  ;;  %v569_v3 = vld [vmem:[#allocation2 + $0x78] sm:$0xff]   ;;  %v570_v5 = vld [vmem:[#allocation2 + $0x70] sm:$0xff]  }
   0xf   :  { %504 = vmatprep.subr.bf16.mxu1 %v618_v0  ;;  %520 = vmatprep.mubr.msk.bf16.mxu1 %vm619_vm0, %v618_v0  ;;  %v44_v2 = vsel %vm42_vm1, %v30_v1, 0  ;;  %v29_v4 = vld [vmem:[%s696_s0] sm:$0xf]  ;;  %v571_v6 = vld [vmem:[#allocation2 + $0x68] sm:$0xff]   ;;  %v573_v8 = vld [vmem:[#allocation2 + $0x58] sm:$0xff]  }
  0x10   :  { %499 = vmatpush3.bf16.msra.mxu0 %v44_v2  ;;  %505 = vmatpush3.bf16.msra.mxu1 %v569_v3  ;;  %v572_v7 = vld [vmem:[#allocation2 + $0x60] sm:$0xff]   ;;  %v574_v9 = vld [vmem:[#allocation2 + $0x50] sm:$0xff]   ;;  %v575_v10 = vld [vmem:[#allocation2 + $0x48] sm:$0xff]  }
  0x11   :  { %524 = vmatprep.subr.bf16.mxu0 %v618_v0  ;;  %506 = vmatprep.subr.bf16.mxu1 %v618_v0  ;;  %v576_v11 = vld [vmem:[#allocation2 + $0x40] sm:$0xff]   ;;  %v577_v12 = vld [vmem:[#allocation2 + $0xb8] sm:$0xff]   ;;  %v578_v13 = vld [vmem:[#allocation2 + $0xb0] sm:$0xff]  }
  0x12   :  { %v579_v14 = vld [vmem:[#allocation2 + $0xa8] sm:$0xff]   ;;  %v580_v15 = vld [vmem:[#allocation2 + $0xa0] sm:$0xff]   ;;  %v581_v16 = vld [vmem:[#allocation2 + $0x98] sm:$0xff]  }
  0x13   :  { %501 = vmatmul.mubr.msk.bf16.vlgmr.msra.gmra.mxu0 %vm38_vm2, %v29_v4  ;;  %v582_v17 = vld [vmem:[#allocation2 + $0x90] sm:$0xff]   ;;  %v437_v18 = vld [vmem:[%s698_s2] ss:$0 sm:$0xff]  ;;  %v583_v26 = vld [vmem:[#allocation2 + $0x88] sm:$0xff]  }
  0x14   :  { %540 = vmatprep.mubr.msk.bf16.mxu0 %vm619_vm0, %v618_v0  ;;  %507 = vmatpush3.bf16.msra.mxu1 %v570_v5  ;;  %v584_v27 = vld [vmem:[#allocation2 + $0x80] sm:$0xff]   ;;  %v585_v28 = vld [vmem:[#allocation2 + $0xf8] sm:$0xff]   ;;  %v586_v29 = vld [vmem:[#allocation2 + $0xf0] sm:$0xff]  }
  0x15   :  { %508 = vmatprep.subr.bf16.mxu1 %v618_v0  ;;  %525 = vmatpush3.bf16.msra.mxu0 %v577_v12  ;;  %v587_v30 = vld [vmem:[#allocation2 + $0xe8] sm:$0xff]   ;;  %v588_v31 = vld [vmem:[#allocation2 + $0xe0] sm:$0xff]   ;;  %v589_v32 = vld [vmem:[#allocation2 + $0xd8] sm:$0xff]  }
  0x16   :  { %526 = vmatprep.subr.bf16.mxu0 %v618_v0  ;;  %v590_v33 = vld [vmem:[#allocation2 + $0xd0] sm:$0xff]   ;;  %v440_v34 = vld [vmem:[%s698_s2 + $0x1] ss:$0 sm:$0xff]  ;;  %v591_v42 = vld [vmem:[#allocation2 + $0xc8] sm:$0xff]  }
  0x17   :  { %v592_v43 = vld [vmem:[#allocation2 + $0xc0] sm:$0xff]  }
  0x18   :  { %509 = vmatpush3.bf16.msra.mxu1 %v571_v6  ;;  %v450_v44 = vld [vmem:[%s698_s2 + $0x2] ss:$0 sm:$0xff]  ;;  %v460_v52 = vld [vmem:[%s698_s2 + $0x3] ss:$0 sm:$0xff] }
  0x19   :  { %510 = vmatprep.subr.bf16.mxu1 %v618_v0  ;;  %527 = vmatpush3.bf16.msra.mxu0 %v578_v13 }
  0x1a   :  { %528 = vmatprep.subr.bf16.mxu0 %v618_v0 }
  0x1c   :  { %511 = vmatpush3.bf16.msra.mxu1 %v572_v7 }
  0x1d   :  { %512 = vmatprep.subr.bf16.mxu1 %v618_v0  ;;  %529 = vmatpush3.bf16.msra.mxu0 %v579_v14 }
  0x1e   :  { %530 = vmatprep.subr.bf16.mxu0 %v618_v0 }
  0x20   :  { %513 = vmatpush3.bf16.msra.mxu1 %v573_v8 }
  0x21   :  { %514 = vmatprep.subr.bf16.mxu1 %v618_v0  ;;  %531 = vmatpush3.bf16.msra.mxu0 %v580_v15 }
  0x22   :  { %532 = vmatprep.subr.bf16.mxu0 %v618_v0 }
  0x24   :  { %515 = vmatpush3.bf16.msra.mxu1 %v574_v9 }
  0x25   :  { %516 = vmatprep.subr.bf16.mxu1 %v618_v0  ;;  %533 = vmatpush3.bf16.msra.mxu0 %v581_v16 }
  0x26   :  { %534 = vmatprep.subr.bf16.mxu0 %v618_v0 }
  0x28   :  { %517 = vmatpush3.bf16.msra.mxu1 %v575_v10 }
  0x29   :  { %518 = vmatprep.subr.bf16.mxu1 %v618_v0  ;;  %535 = vmatpush3.bf16.msra.mxu0 %v582_v17 }
  0x2a   :  { %536 = vmatprep.subr.bf16.mxu0 %v618_v0 }
  0x2c   :  { %519 = vmatpush3.bf16.msra.mxu1 %v576_v11 }
  0x2d   :  { %544 = vmatprep.subr.bf16.mxu1 %v618_v0  ;;  %537 = vmatpush3.bf16.msra.mxu0 %v583_v26 }
  0x2e   :  { %538 = vmatprep.subr.bf16.mxu0 %v618_v0 }
  0x31   :  { %539 = vmatpush3.bf16.msra.mxu0 %v584_v27 }
  0xd3   :  { %v80_v19 = vpop.f32.mrf.mxu0 }
  0xd4   :  { %v81_v20 = vadd.f32 %v437_v18, %v80_v19 }
  0xd5   :  { %v502_v21 = vpop.f32.mrf.mxu0 }
  0xd6   :  { %v86_v22 = vmax.f32 %v81_v20, 0.0 }
  0xd7   :  { %v83_v23 = vpop.f32.mrf.mxu0 }
  0xd8   :  { %v87_v24 = vpack.c.bf16 %v86_v22, %v86_v22 }
  0xd9   :  { %v503_v25 = vpop.f32.mrf.mxu0 }
  0xda   :  { %521 = vmatmul.mubr.bf16.vlgmr.msra.gmra.mxu1 %v87_v24 }
  0xdb   :  { %560 = vmatprep.mubr.msk.bf16.mxu1 %vm619_vm0, %v618_v0  ;;  %545 = vmatpush3.bf16.msra.mxu1 %v585_v28 }
  0xdc   :  { %546 = vmatprep.subr.bf16.mxu1 %v618_v0 }
  0xdf   :  { %547 = vmatpush3.bf16.msra.mxu1 %v586_v29 }
  0xe0   :  { %548 = vmatprep.subr.bf16.mxu1 %v618_v0 }
  0xe3   :  { %549 = vmatpush3.bf16.msra.mxu1 %v587_v30 }
  0xe4   :  { %550 = vmatprep.subr.bf16.mxu1 %v618_v0 }
  0xe7   :  { %551 = vmatpush3.bf16.msra.mxu1 %v588_v31 }
  0xe8   :  { %552 = vmatprep.subr.bf16.mxu1 %v618_v0 }
  0xeb   :  { %553 = vmatpush3.bf16.msra.mxu1 %v589_v32 }
  0xec   :  { %554 = vmatprep.subr.bf16.mxu1 %v618_v0 }
  0xef   :  { %555 = vmatpush3.bf16.msra.mxu1 %v590_v33 }
  0xf0   :  { %556 = vmatprep.subr.bf16.mxu1 %v618_v0 }
  0xf3   :  { %557 = vmatpush3.bf16.msra.mxu1 %v591_v42 }
  0xf4   :  { %558 = vmatprep.subr.bf16.mxu1 %v618_v0 }
  0xf7   :  { %559 = vmatpush3.bf16.msra.mxu1 %v592_v43 }
 0x19a   :  { %v195_v35 = vpop.f32.mrf.mxu1 }
 0x19b   :  { %v196_v36 = vadd.f32 %v440_v34, %v195_v35 }
 0x19c   :  { %v522_v37 = vpop.f32.mrf.mxu1 }
 0x19d   :  { %v201_v38 = vmax.f32 %v196_v36, 0.0 }
 0x19e   :  { %v198_v39 = vpop.f32.mrf.mxu1 }
 0x19f   :  { %v202_v40 = vpack.c.bf16 %v201_v38, %v201_v38 }
 0x1a0   :  { %v523_v41 = vpop.f32.mrf.mxu1 }
 0x1a1   :  { %541 = vmatmul.mubr.bf16.vlgmr.msra.gmra.mxu0 %v202_v40 }
 0x261   :  { %v310_v45 = vpop.f32.mrf.mxu0 }
 0x262   :  { %v311_v46 = vadd.f32 %v450_v44, %v310_v45 }
 0x263   :  { %v542_v47 = vpop.f32.mrf.mxu0 }
 0x264   :  { %v316_v48 = vmax.f32 %v311_v46, 0.0 }
 0x265   :  { %v313_v49 = vpop.f32.mrf.mxu0 }
 0x266   :  { %v317_v50 = vpack.c.bf16 %v316_v48, %v316_v48 }
 0x267   :  { %v543_v51 = vpop.f32.mrf.mxu0 }
 0x268   :  { %561 = vmatmul.mubr.bf16.vlgmr.msra.gmra.mxu1 %v317_v50 }
 0x328   :  { %v425_v53 = vpop.f32.mrf.mxu1 }
 0x329   :  { %v426_v54 = vadd.f32 %v460_v52, %v425_v53 }
 0x32a   :  { %v562_v55 = vpop.f32.mrf.mxu1 }
 0x32b   :  { %431 = vst.msk [vmem:[%s699_s3] sm:$0xff] %vm38_vm2, %v426_v54 }
 0x32c   :  { %v428_v56 = vpop.f32.mrf.mxu1 }
 0x32e   :  { %v563_v57 = vpop.f32.mrf.mxu1 }
 0x32f   :  { %436 = vsyncpa [#allocation3], 1 }

</bundles_post_ra>
